<compile_context>
chip_gen: v6e
topology: v6e:2x2x1
jax: 0.10.0
libtpu: 0.0.40
codegen_flags: <defaults>
</compile_context>

<pallas_src>
import functools
import math

import jax
import jax.numpy as jnp
from jax import lax
from jax.experimental import pallas as pl
from jax.experimental.pallas import tpu as pltpu


def _mhsa_kernel(x_ref, wqv_ref, wk_ref, wo_ref, bo_ref, o_ref,
                 qv_sc, kt_sc, attn_sc,
                 *, head, head_dim, feats, n_actual):
    F = feats
    D = head_dim
    n_pad = x_ref.shape[1]

    x = x_ref[0]                                                   # (n_pad, F) bf16

    # Fused Q/V projection: canonical (n_pad, F) @ (F, 2F) MXU matmul, result kept
    # in bf16 VMEM scratch and sliced per head below.
    qv = jnp.dot(x, wqv_ref[...], preferred_element_type=jnp.float32)
    qv_sc[...] = qv.astype(qv_sc.dtype)

    # K^T projection: Wk_scaled (out,in) contracted with x (n,in) -> (F, n_pad).
    # Per-head K slices become aligned sublane slices and Q@K^T is canonical.
    kt = lax.dot_general(wk_ref[...], x, (((1,), (1,)), ((), ())),
                         preferred_element_type=jnp.float32)
    kt_sc[...] = kt.astype(kt_sc.dtype)

    # Padded-key mask as an additive bias, computed once per grid step (not per head).
    if n_actual < n_pad:
        col = lax.broadcasted_iota(jnp.int32, (1, n_pad), 1)
        kbias = jnp.where(col < n_actual, 0.0, -1e30).astype(jnp.float32)
    else:
        kbias = None

    # Process heads in groups so the attn-slab stores are as lane-dense as possible.
    group = math.gcd(head, max(1, 128 // D))
    for h0 in range(0, head, group):                               # static unroll
        parts = []
        for h in range(h0, h0 + group):
            qh = qv_sc[:, h * D:(h + 1) * D]                       # (n_pad, D) bf16
            kh_t = kt_sc[h * D:(h + 1) * D, :]                     # (D, n_pad) bf16
            vh = qv_sc[:, F + h * D:F + (h + 1) * D]               # (n_pad, D) bf16
            dots = jnp.dot(qh, kh_t, preferred_element_type=jnp.float32)
            if kbias is not None:
                dots = dots + kbias
            dots = dots - jnp.max(dots, axis=-1, keepdims=True)
            e = jnp.exp(dots)                                      # f32 softmax
            p = e * pl.reciprocal(jnp.sum(e, axis=-1, keepdims=True), approx=True)
            pv = jnp.dot(p.astype(jnp.bfloat16), vh,
                         preferred_element_type=jnp.float32)
            parts.append(pv.astype(attn_sc.dtype))
        blk = parts[0] if group == 1 else jnp.concatenate(parts, axis=-1)
        attn_sc[:, h0 * D:(h0 + group) * D] = blk

    # Output projection: canonical (n_pad, F) @ (F, F) + bias.
    out = jnp.dot(attn_sc[...], wo_ref[...],
                  preferred_element_type=jnp.float32) + bo_ref[...]
    # TODO(synk): dropout is p=0.0 (identity); non-zero dropout would need pltpu PRNG.
    o_ref[0] = out.astype(o_ref.dtype)


def _round_up(a, b):
    return ((a + b - 1) // b) * b


def _vmem_limit_bytes(n_pad, F, out_itemsize):
    # Re-derived VMEM budget (review: check against v7x's 64 MiB / 32 MiB scoped limit):
    # double-buffered x/out blocks + double-buffered weight/bias blocks + scratch.
    bf = 2
    blocks = 2 * n_pad * F * bf + 2 * n_pad * F * out_itemsize
    weights = 2 * ((2 * F * F + F * F + F * F) * bf + F * 4)
    scratch = (2 * F * n_pad + F * n_pad + n_pad * F) * bf
    est = blocks + weights + scratch
    return int(max(16 << 20, min(100 << 20, int(1.3 * est))))


def mhsa_forward(x, wq, wk, wv, wo, bo, indexes, *, head):
    B, N, F = x.shape
    assert F % head == 0
    D = F // head
    out_dtype = x.dtype
    inv_sqrt_d = 1.0 / (float(F) ** 0.5)

    # Fold channel_selection2 indexes and the 1/sqrt(feats) scale into the weights,
    # transpose Q/V/O to (in, out) so projections are canonical MXU contractions,
    # and keep Wk in torch (out, in) layout so the kernel emits K^T directly.
    idx = indexes.astype(jnp.float32)
    wq_t = wq.astype(jnp.float32).T * (idx * inv_sqrt_d)[None, :]         # (in, out)
    wv_t = wv.astype(jnp.float32).T * idx[None, :]                        # (in, out)
    wqv_t = jnp.concatenate([wq_t, wv_t], axis=1).astype(jnp.bfloat16)    # (F, 2F)
    wk_s = (wk.astype(jnp.float32) * idx[:, None]).astype(jnp.bfloat16)   # (out, in)
    wo_t = wo.astype(jnp.float32).T.astype(jnp.bfloat16)                  # (in, out)
    bo2 = bo.astype(jnp.float32).reshape(1, F)

    # Pad the sequence to a sublane multiple; padded keys are masked in-kernel,
    # padded query rows are trimmed on return.
    n_pad = _round_up(N, 8)
    x_bf = x.astype(jnp.bfloat16)
    if n_pad != N:
        x_bf = jnp.pad(x_bf, ((0, 0), (0, n_pad - N), (0, 0)))

    kernel = functools.partial(_mhsa_kernel, head=head, head_dim=D,
                               feats=F, n_actual=N)

    out_itemsize = jnp.dtype(out_dtype).itemsize
    flops = int(2 * B * n_pad * F * (4 * F) + 4 * B * n_pad * n_pad * F)
    transcendentals = int(B * head * n_pad * n_pad)
    bytes_accessed = int(x_bf.size * 2 + wqv_t.size * 2 + wk_s.size * 2
                         + wo_t.size * 2 + bo2.size * 4
                         + B * n_pad * F * out_itemsize)

    out = pl.pallas_call(
        kernel,
        out_shape=jax.ShapeDtypeStruct((B, n_pad, F), out_dtype),
        grid_spec=pltpu.PrefetchScalarGridSpec(
            num_scalar_prefetch=0,
            grid=(B,),
            in_specs=[
                pl.BlockSpec((1, n_pad, F), lambda b: (b, 0, 0)),  # x (read once per batch elem)
                pl.BlockSpec((F, 2 * F), lambda b: (0, 0)),        # [Wq | Wv] (in,out), scales folded
                pl.BlockSpec((F, F), lambda b: (0, 0)),            # Wk (out,in), indexes folded
                pl.BlockSpec((F, F), lambda b: (0, 0)),            # Wo (in,out)
                pl.BlockSpec((1, F), lambda b: (0, 0)),            # bo
            ],
            out_specs=pl.BlockSpec((1, n_pad, F), lambda b: (b, 0, 0)),
            scratch_shapes=[
                pltpu.VMEM((n_pad, 2 * F), jnp.bfloat16),  # Q | V (per-head lane slices)
                pltpu.VMEM((F, n_pad), jnp.bfloat16),      # K^T (per-head sublane slices)
                pltpu.VMEM((n_pad, F), jnp.bfloat16),      # attn slab (heads concatenated)
            ],
        ),
        compiler_params=pltpu.CompilerParams(
            dimension_semantics=("parallel",),
            vmem_limit_bytes=_vmem_limit_bytes(n_pad, F, out_itemsize)),
        cost_estimate=pl.CostEstimate(flops=flops,
                                      transcendentals=transcendentals,
                                      bytes_accessed=bytes_accessed),
    )(x_bf, wqv_t, wk_s, wo_t, bo2)

    return out[:, :N, :] if n_pad != N else out


def mhsa_reference(x, wq, wk, wv, wo, bo, indexes, *, head):
    """Pure-JAX f32 transcription of the PyTorch forward for validation."""
    B, N, F = x.shape
    D = F // head
    sqrt_d = float(F) ** 0.5
    q = (x @ wq.T) * indexes
    k = (x @ wk.T) * indexes
    v = (x @ wv.T) * indexes
    q = q.reshape(B, N, head, D).transpose(0, 2, 1, 3)   # (B, H, N, D)
    k = k.reshape(B, N, head, D).transpose(0, 2, 1, 3)
    v = v.reshape(B, N, head, D).transpose(0, 2, 1, 3)
    dots = jnp.einsum("bhif,bhjf->bhij", q, k) / sqrt_d
    score = jax.nn.softmax(dots, axis=-1)
    attn = jnp.einsum("bhij,bhjf->bihf", score, v)        # (B, N, H, D)
    o = attn.reshape(B, N, F) @ wo.T + bo
    return o


if __name__ == "__main__":
    B, N, F, HEAD = 2, 8, 64, 8   # small shapes; head=8 is the module default

    key = jax.random.PRNGKey(0)
    kx, kq, kk, kv, ko, kb = jax.random.split(key, 6)

    x = jax.random.normal(kx, (B, N, F), dtype=jnp.float32)
    # nn.Linear(feats, feats, bias=False) weights: (out_features, in_features)
    wq = jax.random.normal(kq, (F, F), dtype=jnp.float32) * 0.05
    wk = jax.random.normal(kk, (F, F), dtype=jnp.float32) * 0.05
    wv = jax.random.normal(kv, (F, F), dtype=jnp.float32) * 0.05
    wo = jax.random.normal(ko, (F, F), dtype=jnp.float32) * 0.05
    bo = jax.random.normal(kb, (F,), dtype=jnp.float32) * 0.01
    # channel_selection2 initializes indexes to all ones.
    indexes = jnp.ones((F,), dtype=jnp.float32)

    out = mhsa_forward(x, wq, wk, wv, wo, bo, indexes, head=HEAD)
    out = jax.block_until_ready(out)

    ref = mhsa_reference(x, wq, wk, wv, wo, bo, indexes, head=HEAD)
    assert out.shape == (B, N, F)
    # bf16 MXU operands + approx reciprocal -> relaxed tolerance vs. f32 reference.
    assert jnp.allclose(out, ref, atol=2e-2, rtol=2e-2), (
        f"max abs err = {jnp.max(jnp.abs(out - ref))}")

    print("KERNEL_OK")
</pallas_src>

<mosaic_0001>
module attributes {stable_mosaic.version = 11 : i64} {
  func.func @_mhsa_kernel(%arg0: i32, %arg1: memref<1x8x64xbf16, #tpu.memory_space<vmem>>, %arg2: memref<64x128xbf16, #tpu.memory_space<vmem>>, %arg3: memref<64x64xbf16, #tpu.memory_space<vmem>>, %arg4: memref<64x64xbf16, #tpu.memory_space<vmem>>, %arg5: memref<1x64xf32, #tpu.memory_space<vmem>>, %arg6: memref<1x8x64xf32, #tpu.memory_space<vmem>>, %arg7: memref<8x128xbf16, #tpu.memory_space<vmem>>, %arg8: memref<64x8xbf16, #tpu.memory_space<vmem>>, %arg9: memref<8x64xbf16, #tpu.memory_space<vmem>>) attributes {dimension_semantics = [#tpu.dimension_semantics<parallel>], iteration_bounds = array<i64: 2>, scalar_prefetch = 0 : i64, scratch_operands = 3 : i64, tpu.core_type = #tpu.core_type<tc>, window_params = [{transform_indices = @transform_0, window_bounds = array<i64: 1, 8, 64>}, {pipeline_mode = #tpu.pipeline_mode<synchronous>, transform_indices = @transform_1, window_bounds = array<i64: 64, 128>}, {pipeline_mode = #tpu.pipeline_mode<synchronous>, transform_indices = @transform_2, window_bounds = array<i64: 64, 64>}, {pipeline_mode = #tpu.pipeline_mode<synchronous>, transform_indices = @transform_3, window_bounds = array<i64: 64, 64>}, {pipeline_mode = #tpu.pipeline_mode<synchronous>, transform_indices = @transform_4, window_bounds = array<i64: 1, 64>}, {transform_indices = @transform_5, window_bounds = array<i64: 1, 8, 64>}]} {
    %c0 = arith.constant 0 : index
    %c0_0 = arith.constant 0 : index
    %c0_1 = arith.constant 0 : index
    %0 = vector.load %arg1[%c0, %c0_0, %c0_1] : memref<1x8x64xbf16, #tpu.memory_space<vmem>>, vector<1x8x64xbf16>
    %1 = vector.shape_cast %0 : vector<1x8x64xbf16> to vector<8x64xbf16>
    %c0_2 = arith.constant 0 : index
    %c0_3 = arith.constant 0 : index
    %2 = vector.load %arg2[%c0_2, %c0_3] : memref<64x128xbf16, #tpu.memory_space<vmem>>, vector<64x128xbf16>
    %cst = arith.constant dense<0.000000e+00> : vector<8x128xf32>
    %3 = tpu.matmul %1, %2, %cst {dimension_numbers = #tpu.dot_dimension_numbers<[1], [0], [0], [1], [0, 0, 1, 1], [], []>} : vector<8x64xbf16>, vector<64x128xbf16>, vector<8x128xf32> -> vector<8x128xf32>
    %4 = arith.truncf %3 : vector<8x128xf32> to vector<8x128xbf16>
    %c0_4 = arith.constant 0 : index
    %c0_5 = arith.constant 0 : index
    %5 = vector.load %arg7[%c0_4, %c0_5] : memref<8x128xbf16, #tpu.memory_space<vmem>>, vector<8x128xbf16>
    tpu.vector_store %arg7[%c0_4, %c0_5], %4 {strides = array<i32>} : memref<8x128xbf16, #tpu.memory_space<vmem>>, vector<8x128xbf16>,
    %c0_6 = arith.constant 0 : index
    %c0_7 = arith.constant 0 : index
    %6 = vector.load %arg3[%c0_6, %c0_7] : memref<64x64xbf16, #tpu.memory_space<vmem>>, vector<64x64xbf16>
    %cst_8 = arith.constant dense<0.000000e+00> : vector<64x8xf32>
    %7 = tpu.matmul %6, %1, %cst_8 {dimension_numbers = #tpu.dot_dimension_numbers<[1], [1], [0], [0], [0, 0, 1, 0], [], []>} : vector<64x64xbf16>, vector<8x64xbf16>, vector<64x8xf32> -> vector<64x8xf32>
    %8 = arith.truncf %7 : vector<64x8xf32> to vector<64x8xbf16>
    %c0_9 = arith.constant 0 : index
    %c0_10 = arith.constant 0 : index
    %9 = vector.load %arg8[%c0_9, %c0_10] : memref<64x8xbf16, #tpu.memory_space<vmem>>, vector<64x8xbf16>
    tpu.vector_store %arg8[%c0_9, %c0_10], %8 {strides = array<i32>} : memref<64x8xbf16, #tpu.memory_space<vmem>>, vector<64x8xbf16>,
    %c0_11 = arith.constant 0 : index
    %c0_12 = arith.constant 0 : index
    %10 = vector.load %arg7[%c0_11, %c0_12] : memref<8x128xbf16, #tpu.memory_space<vmem>>, vector<8x8xbf16>
    %c0_13 = arith.constant 0 : index
    %c0_14 = arith.constant 0 : index
    %11 = vector.load %arg8[%c0_13, %c0_14] : memref<64x8xbf16, #tpu.memory_space<vmem>>, vector<8x8xbf16>
    %c0_15 = arith.constant 0 : index
    %c64 = arith.constant 64 : index
    %12 = vector.load %arg7[%c0_15, %c64] : memref<8x128xbf16, #tpu.memory_space<vmem>>, vector<8x8xbf16>
    %cst_16 = arith.constant dense<0.000000e+00> : vector<8x8xf32>
    %13 = tpu.matmul %10, %11, %cst_16 {dimension_numbers = #tpu.dot_dimension_numbers<[1], [0], [0], [1], [0, 0, 1, 1], [], []>} : vector<8x8xbf16>, vector<8x8xbf16>, vector<8x8xf32> -> vector<8x8xf32>
    %cst_17 = arith.constant dense<0xFF800000> : vector<8xf32>
    %14 = vector.multi_reduction <maximumf>, %13, %cst_17 [1] : vector<8x8xf32> to vector<8xf32>
    %15 = vector.shape_cast %14 : vector<8xf32> to vector<8x1xf32>
    %16 = vector.broadcast %15 : vector<8x1xf32> to vector<8x8xf32>
    %17 = arith.subf %13, %16 : vector<8x8xf32>
    %18 = math.exp %17 : vector<8x8xf32>
    %cst_18 = arith.constant dense<0.000000e+00> : vector<8xf32>
    %19 = vector.multi_reduction <add>, %18, %cst_18 [1] : vector<8x8xf32> to vector<8xf32>
    %20 = vector.shape_cast %19 : vector<8xf32> to vector<8x1xf32>
    %21 = tpu.reciprocal %20 {approx = true} : vector<8x1xf32> -> vector<8x1xf32>
    %22 = vector.broadcast %21 : vector<8x1xf32> to vector<8x8xf32>
    %23 = arith.mulf %18, %22 : vector<8x8xf32>
    %24 = arith.truncf %23 : vector<8x8xf32> to vector<8x8xbf16>
    %cst_19 = arith.constant dense<0.000000e+00> : vector<8x8xf32>
    %25 = tpu.matmul %24, %12, %cst_19 {dimension_numbers = #tpu.dot_dimension_numbers<[1], [0], [0], [1], [0, 0, 1, 1], [], []>} : vector<8x8xbf16>, vector<8x8xbf16>, vector<8x8xf32> -> vector<8x8xf32>
    %26 = arith.truncf %25 : vector<8x8xf32> to vector<8x8xbf16>
    %c0_20 = arith.constant 0 : index
    %c8 = arith.constant 8 : index
    %27 = vector.load %arg7[%c0_20, %c8] : memref<8x128xbf16, #tpu.memory_space<vmem>>, vector<8x8xbf16>
    %c8_21 = arith.constant 8 : index
    %c0_22 = arith.constant 0 : index
    %28 = vector.load %arg8[%c8_21, %c0_22] : memref<64x8xbf16, #tpu.memory_space<vmem>>, vector<8x8xbf16>
    %c0_23 = arith.constant 0 : index
    %c72 = arith.constant 72 : index
    %29 = vector.load %arg7[%c0_23, %c72] : memref<8x128xbf16, #tpu.memory_space<vmem>>, vector<8x8xbf16>
    %cst_24 = arith.constant dense<0.000000e+00> : vector<8x8xf32>
    %30 = tpu.matmul %27, %28, %cst_24 {dimension_numbers = #tpu.dot_dimension_numbers<[1], [0], [0], [1], [0, 0, 1, 1], [], []>} : vector<8x8xbf16>, vector<8x8xbf16>, vector<8x8xf32> -> vector<8x8xf32>
    %cst_25 = arith.constant dense<0xFF800000> : vector<8xf32>
    %31 = vector.multi_reduction <maximumf>, %30, %cst_25 [1] : vector<8x8xf32> to vector<8xf32>
    %32 = vector.shape_cast %31 : vector<8xf32> to vector<8x1xf32>
    %33 = vector.broadcast %32 : vector<8x1xf32> to vector<8x8xf32>
    %34 = arith.subf %30, %33 : vector<8x8xf32>
    %35 = math.exp %34 : vector<8x8xf32>
    %cst_26 = arith.constant dense<0.000000e+00> : vector<8xf32>
    %36 = vector.multi_reduction <add>, %35, %cst_26 [1] : vector<8x8xf32> to vector<8xf32>
    %37 = vector.shape_cast %36 : vector<8xf32> to vector<8x1xf32>
    %38 = tpu.reciprocal %37 {approx = true} : vector<8x1xf32> -> vector<8x1xf32>
    %39 = vector.broadcast %38 : vector<8x1xf32> to vector<8x8xf32>
    %40 = arith.mulf %35, %39 : vector<8x8xf32>
    %41 = arith.truncf %40 : vector<8x8xf32> to vector<8x8xbf16>
    %cst_27 = arith.constant dense<0.000000e+00> : vector<8x8xf32>
    %42 = tpu.matmul %41, %29, %cst_27 {dimension_numbers = #tpu.dot_dimension_numbers<[1], [0], [0], [1], [0, 0, 1, 1], [], []>} : vector<8x8xbf16>, vector<8x8xbf16>, vector<8x8xf32> -> vector<8x8xf32>
    %43 = arith.truncf %42 : vector<8x8xf32> to vector<8x8xbf16>
    %c0_28 = arith.constant 0 : index
    %c16 = arith.constant 16 : index
    %44 = vector.load %arg7[%c0_28, %c16] : memref<8x128xbf16, #tpu.memory_space<vmem>>, vector<8x8xbf16>
    %c16_29 = arith.constant 16 : index
    %c0_30 = arith.constant 0 : index
    %45 = vector.load %arg8[%c16_29, %c0_30] : memref<64x8xbf16, #tpu.memory_space<vmem>>, vector<8x8xbf16>
    %c0_31 = arith.constant 0 : index
    %c80 = arith.constant 80 : index
    %46 = vector.load %arg7[%c0_31, %c80] : memref<8x128xbf16, #tpu.memory_space<vmem>>, vector<8x8xbf16>
    %cst_32 = arith.constant dense<0.000000e+00> : vector<8x8xf32>
    %47 = tpu.matmul %44, %45, %cst_32 {dimension_numbers = #tpu.dot_dimension_numbers<[1], [0], [0], [1], [0, 0, 1, 1], [], []>} : vector<8x8xbf16>, vector<8x8xbf16>, vector<8x8xf32> -> vector<8x8xf32>
    %cst_33 = arith.constant dense<0xFF800000> : vector<8xf32>
    %48 = vector.multi_reduction <maximumf>, %47, %cst_33 [1] : vector<8x8xf32> to vector<8xf32>
    %49 = vector.shape_cast %48 : vector<8xf32> to vector<8x1xf32>
    %50 = vector.broadcast %49 : vector<8x1xf32> to vector<8x8xf32>
    %51 = arith.subf %47, %50 : vector<8x8xf32>
    %52 = math.exp %51 : vector<8x8xf32>
    %cst_34 = arith.constant dense<0.000000e+00> : vector<8xf32>
    %53 = vector.multi_reduction <add>, %52, %cst_34 [1] : vector<8x8xf32> to vector<8xf32>
    %54 = vector.shape_cast %53 : vector<8xf32> to vector<8x1xf32>
    %55 = tpu.reciprocal %54 {approx = true} : vector<8x1xf32> -> vector<8x1xf32>
    %56 = vector.broadcast %55 : vector<8x1xf32> to vector<8x8xf32>
    %57 = arith.mulf %52, %56 : vector<8x8xf32>
    %58 = arith.truncf %57 : vector<8x8xf32> to vector<8x8xbf16>
    %cst_35 = arith.constant dense<0.000000e+00> : vector<8x8xf32>
    %59 = tpu.matmul %58, %46, %cst_35 {dimension_numbers = #tpu.dot_dimension_numbers<[1], [0], [0], [1], [0, 0, 1, 1], [], []>} : vector<8x8xbf16>, vector<8x8xbf16>, vector<8x8xf32> -> vector<8x8xf32>
    %60 = arith.truncf %59 : vector<8x8xf32> to vector<8x8xbf16>
    %c0_36 = arith.constant 0 : index
    %c24 = arith.constant 24 : index
    %61 = vector.load %arg7[%c0_36, %c24] : memref<8x128xbf16, #tpu.memory_space<vmem>>, vector<8x8xbf16>
    %c24_37 = arith.constant 24 : index
    %c0_38 = arith.constant 0 : index
    %62 = vector.load %arg8[%c24_37, %c0_38] : memref<64x8xbf16, #tpu.memory_space<vmem>>, vector<8x8xbf16>
    %c0_39 = arith.constant 0 : index
    %c88 = arith.constant 88 : index
    %63 = vector.load %arg7[%c0_39, %c88] : memref<8x128xbf16, #tpu.memory_space<vmem>>, vector<8x8xbf16>
    %cst_40 = arith.constant dense<0.000000e+00> : vector<8x8xf32>
    %64 = tpu.matmul %61, %62, %cst_40 {dimension_numbers = #tpu.dot_dimension_numbers<[1], [0], [0], [1], [0, 0, 1, 1], [], []>} : vector<8x8xbf16>, vector<8x8xbf16>, vector<8x8xf32> -> vector<8x8xf32>
    %cst_41 = arith.constant dense<0xFF800000> : vector<8xf32>
    %65 = vector.multi_reduction <maximumf>, %64, %cst_41 [1] : vector<8x8xf32> to vector<8xf32>
    %66 = vector.shape_cast %65 : vector<8xf32> to vector<8x1xf32>
    %67 = vector.broadcast %66 : vector<8x1xf32> to vector<8x8xf32>
    %68 = arith.subf %64, %67 : vector<8x8xf32>
    %69 = math.exp %68 : vector<8x8xf32>
    %cst_42 = arith.constant dense<0.000000e+00> : vector<8xf32>
    %70 = vector.multi_reduction <add>, %69, %cst_42 [1] : vector<8x8xf32> to vector<8xf32>
    %71 = vector.shape_cast %70 : vector<8xf32> to vector<8x1xf32>
    %72 = tpu.reciprocal %71 {approx = true} : vector<8x1xf32> -> vector<8x1xf32>
    %73 = vector.broadcast %72 : vector<8x1xf32> to vector<8x8xf32>
    %74 = arith.mulf %69, %73 : vector<8x8xf32>
    %75 = arith.truncf %74 : vector<8x8xf32> to vector<8x8xbf16>
    %cst_43 = arith.constant dense<0.000000e+00> : vector<8x8xf32>
    %76 = tpu.matmul %75, %63, %cst_43 {dimension_numbers = #tpu.dot_dimension_numbers<[1], [0], [0], [1], [0, 0, 1, 1], [], []>} : vector<8x8xbf16>, vector<8x8xbf16>, vector<8x8xf32> -> vector<8x8xf32>
    %77 = arith.truncf %76 : vector<8x8xf32> to vector<8x8xbf16>
    %c0_44 = arith.constant 0 : index
    %c32 = arith.constant 32 : index
    %78 = vector.load %arg7[%c0_44, %c32] : memref<8x128xbf16, #tpu.memory_space<vmem>>, vector<8x8xbf16>
    %c32_45 = arith.constant 32 : index
    %c0_46 = arith.constant 0 : index
    %79 = vector.load %arg8[%c32_45, %c0_46] : memref<64x8xbf16, #tpu.memory_space<vmem>>, vector<8x8xbf16>
    %c0_47 = arith.constant 0 : index
    %c96 = arith.constant 96 : index
    %80 = vector.load %arg7[%c0_47, %c96] : memref<8x128xbf16, #tpu.memory_space<vmem>>, vector<8x8xbf16>
    %cst_48 = arith.constant dense<0.000000e+00> : vector<8x8xf32>
    %81 = tpu.matmul %78, %79, %cst_48 {dimension_numbers = #tpu.dot_dimension_numbers<[1], [0], [0], [1], [0, 0, 1, 1], [], []>} : vector<8x8xbf16>, vector<8x8xbf16>, vector<8x8xf32> -> vector<8x8xf32>
    %cst_49 = arith.constant dense<0xFF800000> : vector<8xf32>
    %82 = vector.multi_reduction <maximumf>, %81, %cst_49 [1] : vector<8x8xf32> to vector<8xf32>
    %83 = vector.shape_cast %82 : vector<8xf32> to vector<8x1xf32>
    %84 = vector.broadcast %83 : vector<8x1xf32> to vector<8x8xf32>
    %85 = arith.subf %81, %84 : vector<8x8xf32>
    %86 = math.exp %85 : vector<8x8xf32>
    %cst_50 = arith.constant dense<0.000000e+00> : vector<8xf32>
    %87 = vector.multi_reduction <add>, %86, %cst_50 [1] : vector<8x8xf32> to vector<8xf32>
    %88 = vector.shape_cast %87 : vector<8xf32> to vector<8x1xf32>
    %89 = tpu.reciprocal %88 {approx = true} : vector<8x1xf32> -> vector<8x1xf32>
    %90 = vector.broadcast %89 : vector<8x1xf32> to vector<8x8xf32>
    %91 = arith.mulf %86, %90 : vector<8x8xf32>
    %92 = arith.truncf %91 : vector<8x8xf32> to vector<8x8xbf16>
    %cst_51 = arith.constant dense<0.000000e+00> : vector<8x8xf32>
    %93 = tpu.matmul %92, %80, %cst_51 {dimension_numbers = #tpu.dot_dimension_numbers<[1], [0], [0], [1], [0, 0, 1, 1], [], []>} : vector<8x8xbf16>, vector<8x8xbf16>, vector<8x8xf32> -> vector<8x8xf32>
    %94 = arith.truncf %93 : vector<8x8xf32> to vector<8x8xbf16>
    %c0_52 = arith.constant 0 : index
    %c40 = arith.constant 40 : index
    %95 = vector.load %arg7[%c0_52, %c40] : memref<8x128xbf16, #tpu.memory_space<vmem>>, vector<8x8xbf16>
    %c40_53 = arith.constant 40 : index
    %c0_54 = arith.constant 0 : index
    %96 = vector.load %arg8[%c40_53, %c0_54] : memref<64x8xbf16, #tpu.memory_space<vmem>>, vector<8x8xbf16>
    %c0_55 = arith.constant 0 : index
    %c104 = arith.constant 104 : index
    %97 = vector.load %arg7[%c0_55, %c104] : memref<8x128xbf16, #tpu.memory_space<vmem>>, vector<8x8xbf16>
    %cst_56 = arith.constant dense<0.000000e+00> : vector<8x8xf32>
    %98 = tpu.matmul %95, %96, %cst_56 {dimension_numbers = #tpu.dot_dimension_numbers<[1], [0], [0], [1], [0, 0, 1, 1], [], []>} : vector<8x8xbf16>, vector<8x8xbf16>, vector<8x8xf32> -> vector<8x8xf32>
    %cst_57 = arith.constant dense<0xFF800000> : vector<8xf32>
    %99 = vector.multi_reduction <maximumf>, %98, %cst_57 [1] : vector<8x8xf32> to vector<8xf32>
    %100 = vector.shape_cast %99 : vector<8xf32> to vector<8x1xf32>
    %101 = vector.broadcast %100 : vector<8x1xf32> to vector<8x8xf32>
    %102 = arith.subf %98, %101 : vector<8x8xf32>
    %103 = math.exp %102 : vector<8x8xf32>
    %cst_58 = arith.constant dense<0.000000e+00> : vector<8xf32>
    %104 = vector.multi_reduction <add>, %103, %cst_58 [1] : vector<8x8xf32> to vector<8xf32>
    %105 = vector.shape_cast %104 : vector<8xf32> to vector<8x1xf32>
    %106 = tpu.reciprocal %105 {approx = true} : vector<8x1xf32> -> vector<8x1xf32>
    %107 = vector.broadcast %106 : vector<8x1xf32> to vector<8x8xf32>
    %108 = arith.mulf %103, %107 : vector<8x8xf32>
    %109 = arith.truncf %108 : vector<8x8xf32> to vector<8x8xbf16>
    %cst_59 = arith.constant dense<0.000000e+00> : vector<8x8xf32>
    %110 = tpu.matmul %109, %97, %cst_59 {dimension_numbers = #tpu.dot_dimension_numbers<[1], [0], [0], [1], [0, 0, 1, 1], [], []>} : vector<8x8xbf16>, vector<8x8xbf16>, vector<8x8xf32> -> vector<8x8xf32>
    %111 = arith.truncf %110 : vector<8x8xf32> to vector<8x8xbf16>
    %c0_60 = arith.constant 0 : index
    %c48 = arith.constant 48 : index
    %112 = vector.load %arg7[%c0_60, %c48] : memref<8x128xbf16, #tpu.memory_space<vmem>>, vector<8x8xbf16>
    %c48_61 = arith.constant 48 : index
    %c0_62 = arith.constant 0 : index
    %113 = vector.load %arg8[%c48_61, %c0_62] : memref<64x8xbf16, #tpu.memory_space<vmem>>, vector<8x8xbf16>
    %c0_63 = arith.constant 0 : index
    %c112 = arith.constant 112 : index
    %114 = vector.load %arg7[%c0_63, %c112] : memref<8x128xbf16, #tpu.memory_space<vmem>>, vector<8x8xbf16>
    %cst_64 = arith.constant dense<0.000000e+00> : vector<8x8xf32>
    %115 = tpu.matmul %112, %113, %cst_64 {dimension_numbers = #tpu.dot_dimension_numbers<[1], [0], [0], [1], [0, 0, 1, 1], [], []>} : vector<8x8xbf16>, vector<8x8xbf16>, vector<8x8xf32> -> vector<8x8xf32>
    %cst_65 = arith.constant dense<0xFF800000> : vector<8xf32>
    %116 = vector.multi_reduction <maximumf>, %115, %cst_65 [1] : vector<8x8xf32> to vector<8xf32>
    %117 = vector.shape_cast %116 : vector<8xf32> to vector<8x1xf32>
    %118 = vector.broadcast %117 : vector<8x1xf32> to vector<8x8xf32>
    %119 = arith.subf %115, %118 : vector<8x8xf32>
    %120 = math.exp %119 : vector<8x8xf32>
    %cst_66 = arith.constant dense<0.000000e+00> : vector<8xf32>
    %121 = vector.multi_reduction <add>, %120, %cst_66 [1] : vector<8x8xf32> to vector<8xf32>
    %122 = vector.shape_cast %121 : vector<8xf32> to vector<8x1xf32>
    %123 = tpu.reciprocal %122 {approx = true} : vector<8x1xf32> -> vector<8x1xf32>
    %124 = vector.broadcast %123 : vector<8x1xf32> to vector<8x8xf32>
    %125 = arith.mulf %120, %124 : vector<8x8xf32>
    %126 = arith.truncf %125 : vector<8x8xf32> to vector<8x8xbf16>
    %cst_67 = arith.constant dense<0.000000e+00> : vector<8x8xf32>
    %127 = tpu.matmul %126, %114, %cst_67 {dimension_numbers = #tpu.dot_dimension_numbers<[1], [0], [0], [1], [0, 0, 1, 1], [], []>} : vector<8x8xbf16>, vector<8x8xbf16>, vector<8x8xf32> -> vector<8x8xf32>
    %128 = arith.truncf %127 : vector<8x8xf32> to vector<8x8xbf16>
    %c0_68 = arith.constant 0 : index
    %c56 = arith.constant 56 : index
    %129 = vector.load %arg7[%c0_68, %c56] : memref<8x128xbf16, #tpu.memory_space<vmem>>, vector<8x8xbf16>
    %c56_69 = arith.constant 56 : index
    %c0_70 = arith.constant 0 : index
    %130 = vector.load %arg8[%c56_69, %c0_70] : memref<64x8xbf16, #tpu.memory_space<vmem>>, vector<8x8xbf16>
    %c0_71 = arith.constant 0 : index
    %c120 = arith.constant 120 : index
    %131 = vector.load %arg7[%c0_71, %c120] : memref<8x128xbf16, #tpu.memory_space<vmem>>, vector<8x8xbf16>
    %cst_72 = arith.constant dense<0.000000e+00> : vector<8x8xf32>
    %132 = tpu.matmul %129, %130, %cst_72 {dimension_numbers = #tpu.dot_dimension_numbers<[1], [0], [0], [1], [0, 0, 1, 1], [], []>} : vector<8x8xbf16>, vector<8x8xbf16>, vector<8x8xf32> -> vector<8x8xf32>
    %cst_73 = arith.constant dense<0xFF800000> : vector<8xf32>
    %133 = vector.multi_reduction <maximumf>, %132, %cst_73 [1] : vector<8x8xf32> to vector<8xf32>
    %134 = vector.shape_cast %133 : vector<8xf32> to vector<8x1xf32>
    %135 = vector.broadcast %134 : vector<8x1xf32> to vector<8x8xf32>
    %136 = arith.subf %132, %135 : vector<8x8xf32>
    %137 = math.exp %136 : vector<8x8xf32>
    %cst_74 = arith.constant dense<0.000000e+00> : vector<8xf32>
    %138 = vector.multi_reduction <add>, %137, %cst_74 [1] : vector<8x8xf32> to vector<8xf32>
    %139 = vector.shape_cast %138 : vector<8xf32> to vector<8x1xf32>
    %140 = tpu.reciprocal %139 {approx = true} : vector<8x1xf32> -> vector<8x1xf32>
    %141 = vector.broadcast %140 : vector<8x1xf32> to vector<8x8xf32>
    %142 = arith.mulf %137, %141 : vector<8x8xf32>
    %143 = arith.truncf %142 : vector<8x8xf32> to vector<8x8xbf16>
    %cst_75 = arith.constant dense<0.000000e+00> : vector<8x8xf32>
    %144 = tpu.matmul %143, %131, %cst_75 {dimension_numbers = #tpu.dot_dimension_numbers<[1], [0], [0], [1], [0, 0, 1, 1], [], []>} : vector<8x8xbf16>, vector<8x8xbf16>, vector<8x8xf32> -> vector<8x8xf32>
    %145 = arith.truncf %144 : vector<8x8xf32> to vector<8x8xbf16>
    %146 = tpu.concatenate %26, %43, %60, %77, %94, %111, %128, %145 in 1 : vector<8x8xbf16>, vector<8x8xbf16>, vector<8x8xbf16>, vector<8x8xbf16>, vector<8x8xbf16>, vector<8x8xbf16>, vector<8x8xbf16>, vector<8x8xbf16> -> vector<8x64xbf16>
    %c0_76 = arith.constant 0 : index
    %c0_77 = arith.constant 0 : index
    %147 = vector.load %arg9[%c0_76, %c0_77] : memref<8x64xbf16, #tpu.memory_space<vmem>>, vector<8x64xbf16>
    tpu.vector_store %arg9[%c0_76, %c0_77], %146 {strides = array<i32>} : memref<8x64xbf16, #tpu.memory_space<vmem>>, vector<8x64xbf16>,
    %c0_78 = arith.constant 0 : index
    %c0_79 = arith.constant 0 : index
    %148 = vector.load %arg9[%c0_78, %c0_79] : memref<8x64xbf16, #tpu.memory_space<vmem>>, vector<8x64xbf16>
    %c0_80 = arith.constant 0 : index
    %c0_81 = arith.constant 0 : index
    %149 = vector.load %arg4[%c0_80, %c0_81] : memref<64x64xbf16, #tpu.memory_space<vmem>>, vector<64x64xbf16>
    %cst_82 = arith.constant dense<0.000000e+00> : vector<8x64xf32>
    %150 = tpu.matmul %148, %149, %cst_82 {dimension_numbers = #tpu.dot_dimension_numbers<[1], [0], [0], [1], [0, 0, 1, 1], [], []>} : vector<8x64xbf16>, vector<64x64xbf16>, vector<8x64xf32> -> vector<8x64xf32>
    %c0_83 = arith.constant 0 : index
    %c0_84 = arith.constant 0 : index
    %151 = vector.load %arg5[%c0_83, %c0_84] : memref<1x64xf32, #tpu.memory_space<vmem>>, vector<1x64xf32>
    %152 = vector.broadcast %151 : vector<1x64xf32> to vector<8x64xf32>
    %153 = arith.addf %150, %152 : vector<8x64xf32>
    %c0_85 = arith.constant 0 : index
    %c0_86 = arith.constant 0 : index
    %c0_87 = arith.constant 0 : index
    %154 = vector.load %arg6[%c0_85, %c0_86, %c0_87] : memref<1x8x64xf32, #tpu.memory_space<vmem>>, vector<1x8x64xf32>
    %155 = vector.shape_cast %154 : vector<1x8x64xf32> to vector<8x64xf32>
    %156 = vector.shape_cast %153 : vector<8x64xf32> to vector<1x8x64xf32>
    tpu.vector_store %arg6[%c0_85, %c0_86, %c0_87], %156 {strides = array<i32>} : memref<1x8x64xf32, #tpu.memory_space<vmem>>, vector<1x8x64xf32>,
    return
  }
  func.func @transform_0(%arg0: i32) -> (i32, i32, i32) {
    %c0_i32 = arith.constant 0 : i32
    %c0_i32_0 = arith.constant 0 : i32
    %c0_i32_1 = arith.constant 0 : i32
    return %arg0, %c0_i32, %c0_i32_0 : i32, i32, i32
  }
  func.func @transform_1(%arg0: i32) -> (i32, i32) {
    %c0_i32 = arith.constant 0 : i32
    %c0_i32_0 = arith.constant 0 : i32
    %c0_i32_1 = arith.constant 0 : i32
    return %c0_i32, %c0_i32_0 : i32, i32
  }
  func.func @transform_2(%arg0: i32) -> (i32, i32) {
    %c0_i32 = arith.constant 0 : i32
    %c0_i32_0 = arith.constant 0 : i32
    %c0_i32_1 = arith.constant 0 : i32
    return %c0_i32, %c0_i32_0 : i32, i32
  }
  func.func @transform_3(%arg0: i32) -> (i32, i32) {
    %c0_i32 = arith.constant 0 : i32
    %c0_i32_0 = arith.constant 0 : i32
    %c0_i32_1 = arith.constant 0 : i32
    return %c0_i32, %c0_i32_0 : i32, i32
  }
  func.func @transform_4(%arg0: i32) -> (i32, i32) {
    %c0_i32 = arith.constant 0 : i32
    %c0_i32_0 = arith.constant 0 : i32
    %c0_i32_1 = arith.constant 0 : i32
    return %c0_i32, %c0_i32_0 : i32, i32
  }
  func.func @transform_5(%arg0: i32) -> (i32, i32, i32) {
    %c0_i32 = arith.constant 0 : i32
    %c0_i32_0 = arith.constant 0 : i32
    %c0_i32_1 = arith.constant 0 : i32
    return %arg0, %c0_i32, %c0_i32_0 : i32, i32, i32
  }
}

</mosaic_0001>

<bundles_post_ra>
// kernel: tpu_custom_call.1
= control target key start
LH: loop header
LB: loop body
LE: loop exit
PB: predicated region body
PF: predicated region fallthrough
CT: control target
= control target key end

     0   :  { %10 = vsyncpa [#allocation6], 0  ;;  %s2653_s0 = inlined_call_operand.hbm [shape: bf16[2,8,64], index: 0, kind: input, shape index: {}]   ;;  %s2654_s1 = inlined_call_operand.hbm [shape: bf16[64,128], index: 1, kind: input, shape index: {}]   ;;  %s2655_s2 = inlined_call_operand.hbm [shape: bf16[64,64], index: 2, kind: input, shape index: {}]   ;;  %s2656_s3 = inlined_call_operand.hbm [shape: bf16[64,64], index: 3, kind: input, shape index: {}]   ;;  %s2657_s4 = inlined_call_operand.vmem [shape: f32[1,64], index: 4, kind: input, shape index: {}]   ;;  %s2658_s5 = inlined_call_operand.hbm [shape: f32[2,8,64], index: 5, kind: output, shape index: {}]  }
   0x1   :  { %12 = vsyncpa [#allocation6 + $0x1], 0 }
   0x2   :  { %13 = vsyncpa [#allocation9], 0 }
   0x3   :  { %14 = vsyncpa [#allocation12], 0 }
   0x4   :  { %15 = vsyncpa [#allocation7], 0 }
   0x5   :  { %17 = vsyncpa [#allocation7 + $0x1], 0  ;;  %s2259_s18 = smov 0   ;;  %s2261_s19 = smov 0  }
   0x6   :  { %s2263_s20 = smov 0   ;;  %s2265_s21 = smov 0  }
   0x7 LB: > { %s2280_s22 = sadd.s32 4294967295, %s2203_s21   ;;  %s1636_s23 = sadd.s32 4294967294, %s2203_s21   ;;  %s2203_s21 = sphi %s2265_s21, %s2682_s21   ;;  %s2199_s20 = sphi %s2263_s20, %s2681_s20   ;;  %s2195_s19 = sphi %s2261_s19, %s2680_s19   ;;  %s2191_s18 = sphi %s2259_s18, %s2679_s18  }
   0x8   : > { %p43_p0 = scmp.ne.s32.totalorder %s2195_s19, %s2191_s18  ;;  %p2659_p1 = scmp.eq.s32.totalorder %s2280_s22, 0 }
   0x9   : > { %p157_p3 = scmp.eq.s32.totalorder %s1636_s23, 1  ;;  %p1637_p5 = scmp.ge.s32.totalorder %s2203_s21, 1 }
   0xa   : > { %p2289_p4 = por %p2659_p1, %p43_p0  ;;  %p164_p7 = scmp.lt.s32.totalorder %s2203_s21, 3 }
   0xb   : > { %p2294_p6 = por %p157_p3, %p43_p0  ;;  %s2205_s27 = smov [#allocation8]  }
   0xc   : > { %s2663_s24 = scalar_select %p2289_p4, 1, 0 }
   0xd   : > { %s2664_s25 = scalar_select %p2294_p6, 1, 0 }
   0xe   : > { %p2299_p8 = pnand %p1637_p5, %p164_p7  ;;  %s176_s28 = sshll.u32 %s2205_s27, 4  ;;  %s177_s28 = int_to_ptr.vmem [resolvable:$true] %s176_s28 }
   0xf   : > { %s2206_s30 = smov [#allocation10]   ;;  %s2207_s7 = smov [#allocation11]  }
  0x10   : > { %s2665_s26 = scalar_select %p2299_p8, 1, 0 }
  0x11   : > { %p1900_p9 = pneg %p2299_p8  ;;  %s189_s6 = sshll.u32 %s2206_s30, 4  ;;  %s190_s6 = int_to_ptr.vmem [resolvable:$true] %s189_s6 }
  0x12   : > { %s202_s8 = sshll.u32 %s2207_s7, 4  ;;  %s2036_s9 = scalar_lea.vmem %s177_s28, 512  ;;  %s203_s8 = int_to_ptr.vmem [resolvable:$true] %s202_s8 }
  0x13   : > { %p2308_p11 = pnand %p1900_p9, %p2659_p1  ;;  %p2037_p13 = scmp.ne.s32.totalorder %s177_s28, %s2036_s9 }
  0x14   : > { %p2044_p5 = scmp.lt.s32.totalorder %s177_s28, %s177_s28  ;;  %p2045_p7 = scmp.lt.s32.totalorder %s2036_s9, %s2036_s9 }
  0x15   : > { %p2027_p12 = pneg %p2308_p11 }
  0x16   : > { %p2046_p9 = por %p2045_p7, %p2044_p5 }
  0x17   : > { %p2039_p0 = pnand %p2037_p13, %p2027_p12 }
  0x19   : > { %p2040_p3 = pneg %p2039_p0 }
  0x1b   : > { %p2047_p10 = pnand %p2046_p9, %p2040_p3 }
  0x1d   : > { %2050 = shalt.err (!%p2047_p10)
}
  0x1e   : > { %s2208_s10 = smov 64   ;;  %s2209_s11 = smov 4  }
  0x1f   : > { %1903 = dma.hbm_to_vmem [thread:$0]  (!%p2308_p11), %s2654_s1, 512, %s177_s28, [#allocation9], %s2208_s10, %s2208_s10, %s2209_s11  }
  0x20   : > { %s2062_s14 = scalar_lea.vmem %s190_s6, 512  ;;  %p2070_p2 = scmp.lt.s32.totalorder %s190_s6, %s190_s6 }
  0x21   : > { %p2063_p1 = scmp.ne.s32.totalorder %s190_s6, %s2062_s14  ;;  %p2071_p6 = scmp.lt.s32.totalorder %s2062_s14, %s2062_s14 }
  0x23   : > { %p2065_p13 = pnand %p2063_p1, %p2027_p12  ;;  %p2072_p5 = por %p2071_p6, %p2070_p2 }
  0x25   : > { %p2066_p0 = pneg %p2065_p13 }
  0x27   : > { %p2073_p3 = pnand %p2072_p5, %p2066_p0 }
  0x29   : > { %2076 = shalt.err (!%p2073_p3)
}
  0x2a   : > { %1906 = dma.hbm_to_vmem [thread:$0]  (!%p2308_p11), %s2655_s2, 512, %s190_s6, [#allocation9], %s2208_s10, %s2208_s10, %s2209_s11  }
  0x2b   : > { %s2088_s17 = scalar_lea.vmem %s203_s8, 512  ;;  %p2096_p9 = scmp.lt.s32.totalorder %s203_s8, %s203_s8 }
  0x2c   : > { %p2089_p10 = scmp.ne.s32.totalorder %s203_s8, %s2088_s17  ;;  %p2097_p13 = scmp.lt.s32.totalorder %s2088_s17, %s2088_s17 }
  0x2e   : > { %p2091_p7 = pnand %p2089_p10, %p2027_p12  ;;  %p2098_p4 = por %p2097_p13, %p2096_p9 }
  0x30   : > { %p2092_p1 = pneg %p2091_p7 }
  0x32   : > { %p2099_p2 = pnand %p2098_p4, %p2092_p1 }
  0x34   : > { %2102 = shalt.err (!%p2099_p2)
}
  0x35   : > { %1909 = dma.hbm_to_vmem [thread:$0]  (!%p2308_p11), %s2656_s3, 512, %s203_s8, [#allocation12], %s2208_s10, %s2208_s10, %s2209_s11  }
  0x36   : > { %s2339_s28 = sadd.s32 1, %s2203_s21   ;;  %s30_s29 = sadd.s32 1, %s2199_s20 }
  0x37   : > { %s27_s30 = ssub.s32 %s2203_s21, %s2339_s28  ;;  %p37_p6 = scmp.ne.s32.totalorder %s2199_s20, %s2195_s19 }
  0x38   : > { %p28_p4 = scmp.eq.s32.totalorder %s27_s30, 0  ;;  %p38_p12 = scmp.eq.s32.totalorder %s2203_s21, 0 }
  0x39   : > { %p1921_p0 = scmp.lt.s32.totalorder %s2203_s21, 2  ;;  %p2667_p3 = scmp.eq.s32.totalorder %s2280_s22, 1 }
  0x3a   : > { %s2349_s6 = scalar_select %p28_p4, %s2199_s20, %s30_s29  }
  0x3b   : > { %p39_p5 = por %p38_p12, %p37_p6  ;;  %p2353_p10 = por %p2667_p3, %p37_p6 }
  0x3c   : > { %s219_s9 = sand.u32 1, %s2199_s20   ;;  %s1643_s12 = sshll.u32 %s2203_s21, 6 }
  0x3d   : > { %s2668_s7 = scalar_select %p2353_p10, 1, 0 }
  0x3e   : > { %s1642_s8 = sshll.u32 %s219_s9, 2  ;;  %s2362_s13 = scalar_lea.hbm %s2653_s0, %s1643_s12 }
  0x3f   : > { %s223_s14 = scalar_lea.vmem [#allocation5], %s1642_s8  ;;  %p2364_p11 = pnand %p1921_p0, %p39_p5 }
  0x40   : > { %s230_s15 = sshll.u32 %s223_s14, 4  ;;  %s220_s17 = scalar_lea.sflag [#allocation6], %s219_s9  ;;  %s231_s15 = int_to_ptr.vmem [resolvable:$true] %s230_s15 }
  0x41   : > { %s2103_s23 = scalar_lea.hbm %s2362_s13, 64  ;;  %p2105_p1 = pneg %p2364_p11 }
  0x42   : > { %p2104_p7 = scmp.ne.s32.totalorder %s2362_s13, %s2103_s23  ;;  %s2108_s29 = scalar_lea.hbm %s2653_s0, 128 }
  0x43   : > { %p2109_p2 = scmp.lt.s32.totalorder %s2362_s13, %s2653_s0  ;;  %p2110_p4 = scmp.lt.s32.totalorder %s2108_s29, %s2103_s23 }
  0x44   : > { %p2106_p9 = pnand %p2105_p1, %p2104_p7 }
  0x45   : > { %p2111_p6 = por %p2110_p4, %p2109_p2 }
  0x46   : > { %p2107_p13 = pneg %p2106_p9 }
  0x48   : > { %p2112_p12 = pnand %p2111_p6, %p2107_p13 }
  0x4a   : > { %2115 = shalt.err (!%p2112_p12)
}
  0x4b   : > { %s2116_s10 = scalar_lea.vmem %s231_s15, 64  ;;  %s2210_s9 = smov [#allocation5]  }
  0x4c   : > { %p2117_p0 = scmp.ne.s32.totalorder %s231_s15, %s2116_s10  ;;  %s2121_s11 = sshll.u32 %s2210_s9, 4  ;;  %s2122_s11 = int_to_ptr.vmem [resolvable:$false] %s2121_s11 }
  0x4d   : > { %s2123_s14 = scalar_lea.vmem %s2122_s11, 128  ;;  %p2124_p7 = scmp.lt.s32.totalorder %s231_s15, %s2122_s11 }
  0x4e   : > { %p2119_p5 = pnand %p2117_p0, %p2105_p1  ;;  %p2125_p9 = scmp.lt.s32.totalorder %s2123_s14, %s2116_s10 }
  0x50   : > { %p2120_p3 = pneg %p2119_p5  ;;  %p2126_p10 = por %p2125_p9, %p2124_p7 }
  0x52   : > { %p2127_p8 = pnand %p2126_p10, %p2120_p3 }
  0x54   : > { %2130 = shalt.err (!%p2127_p8)
}
  0x55   : > { %1913 = dma.hbm_to_vmem [thread:$0]  (!%p2364_p11), %s2362_s13, 64, %s231_s15, %s220_s17  }
  0x56   : > { %p2670_p13 = scmp.ne.s32.totalorder %s2665_s26, 0 }
  0x57   : > { %s2385_s23 = sand.u32 (!%p2670_p13), 1, %s2195_s19   ;;  %p2671_p1 = scmp.ne.s32.totalorder (!%p2670_p13), %s2663_s24, 0 }
  0x58   : > { %239 = sbr.rel (%p2670_p13) target bundleno = 1571 (0x623), region = 40  ;;  %s1645_s27 = sshll.u32 (!%p2670_p13), %s2385_s23, 2 }
  0x59   : > { %s242_s30 = scalar_lea.sflag (!%p2670_p13), [#allocation6], %s2385_s23  ;;  %s245_s29 = scalar_lea.vmem (!%p2670_p13), [#allocation5], %s1645_s27 }
  0x5d   : > { %2174 = dma.done.wait (%p2671_p1), %s242_s30, 64  }
  0x5e   : > { %2176 = vsyncadd (%p2671_p1), %s242_s30, 4294967232  ;;  %p2672_p8 = scmp.eq.s32.totalorder %s2280_s22, 0 }
  0x60   : > { %2178 = dma.done.wait (%p2672_p8), [#allocation9], 1024   ;;  %p2673_p10 = pmov %p2672_p8 }
  0x61   : > { %p2674_p11 = pmov %p2672_p8 }
  0x62   : > { %2180 = vsyncadd (%p2673_p10), [#allocation9], 4294966272 }
  0x63   : > { %2182 = dma.done.wait (%p2674_p11), [#allocation12], 512   ;;  %p2675_p2 = pmov %p2672_p8 }
  0x64   : > { %v2211_v0 = vmov 0.0   ;;  %vm2212_vm0 = vmmov 0   ;;  %vm318_vm1 = vcmask 523264   ;;  %v1980_v1 = vld [vmem:[#allocation8 + $0x18] sm:$0xff]   ;;  %v1981_v4 = vld [vmem:[#allocation8 + $0x10] sm:$0xff]   ;;  %v1983_v5 = vld [vmem:[#allocation10] sm:$0xff]  }
  0x65   : > { %2184 = vsyncadd (%p2675_p2), [#allocation12], 4294966784  ;;  %1753 = vmatprep.subr.bf16.mxu0 %v2211_v0  ;;  %1761 = vmatprep.mubr.msk.bf16.mxu0 %vm2212_vm0, %v2211_v0  ;;  %v285_v2 = vld [vmem:[%s245_s29] sm:$0xf]  ;;  %v1982_v6 = vld [vmem:[#allocation8 + $0x8] sm:$0xff]   ;;  %vm501_vm2 = vcmask 60416  }
  0x66   : > { %1754 = vmatpush3.bf16.msra.mxu0 %v1980_v1  ;;  %1883 = vmatprep.subr.msk.bf16.mxu1 %vm318_vm1, %v285_v2  ;;  %v320_v3 = vsel %vm318_vm1, %v285_v2, 0  ;;  %v1984_v7 = vld [vmem:[#allocation10 + $0x8] sm:$0xff]   ;;  %v1986_v8 = vld [vmem:[#allocation10 + $0x10] sm:$0xff]   ;;  %v1985_v9 = vld [vmem:[#allocation8] sm:$0xff]   ;;  %vm516_vm3 = vcmask 1043456   ;;  %vm512_vm4 = vcmask 64512  }
  0x67   : > { %1766 = vmatpush3.bf16.xpose.msra.mxu1 %v320_v3  ;;  %1755 = vmatprep.subr.bf16.mxu0 %v2211_v0  ;;  %v1987_v10 = vld [vmem:[#allocation10 + $0x18] sm:$0xff]   ;;  %s2213_s24 = smov 104   ;;  %s2214_s26 = smov 120   ;;  %vm1418_vm5 = vcmask 130048   ;;  %vm1421_vm6 = vcmask 195584   ;;  %vm1424_vm7 = vcmask 261120  }
  0x68   : > { %1775 = vmatprep.subr.bf16.mxu1 %v2211_v0  ;;  %1767 = vmatprep.mubr.msk.bf16.mxu1 %vm318_vm1, %v1983_v5  ;;  %s2215_s13 = smov 96   ;;  %s2216_s15 = smov 112   ;;  %vm1427_vm8 = vcmask 326656   ;;  %vm1430_vm9 = vcmask 392192   ;;  %vm1433_vm10 = vcmask 457728   ;;  %vm1437_vm11 = vcmask 519168  }
  0x69   : > { %s2217_s16 = smov 80   ;;  %s2218_s17 = smov 88  }
  0x6a   : > { %1756 = vmatpush3.bf16.msra.mxu0 %v1981_v4  ;;  %s2219_s12 = smov 72   ;;  %s2220_s8 = smov 56  }
  0x6b   : > { %1757 = vmatprep.subr.bf16.mxu0 %v2211_v0  ;;  %s2221_s10 = smov 64   ;;  %s2222_s9 = smov 48  }
  0x6c   : > { %s2223_s11 = smov 40   ;;  %s2224_s14 = smov 24  }
  0x6d   : > { %s2225_s27 = smov 16   ;;  %s2226_s30 = smov 8  }
  0x6e   : > { %1758 = vmatpush3.bf16.msra.mxu0 %v1982_v6  ;;  %1768 = vmatmul.mubr.msk.bf16.vlgmr.msra.gmra.mxu1 %vm318_vm1, %v1984_v7  ;;  %s2227_s29 = smov 32   ;;  %p2676_p6 = scmp.ne.s32.totalorder %s2668_s7, 0 }
  0x6f   : > { %1759 = vmatprep.subr.bf16.mxu0 %v2211_v0  ;;  %1771 = vmatprep.mubr.msk.bf16.mxu1 %vm318_vm1, %v1986_v8 }
  0x72   : > { %1760 = vmatpush3.bf16.msra.mxu0 %v1985_v9 }
  0x73   : > { %1787 = vmatprep.subr.bf16.mxu0 %v2211_v0 }
  0x75   : > { %1762 = vmatmul.mubr.msk.bf16.vlgmr.msra.gmra.mxu0 %vm318_vm1, %v285_v2 }
  0x76   : > { %1772 = vmatmul.mubr.msk.bf16.gmra.mxu1 %vm318_vm1, %v1987_v10  ;;  %1789 = vmatprep.mubr.msk.bf16.mxu0 %vm2212_vm0, %v2211_v0 }
  0x77   : > { %1777 = vmatprep.mubr.msk.bf16.mxu1 %vm2212_vm0, %v2211_v0 }
 0x12e   : > { %v1769_v11 = vpop.f32.mrf.mxu1 }
 0x12f   : > { %v1700_v12 = vpack.c.bf16 %v1769_v11, %v1769_v11 }
 0x130   : > { %v438_v13 = vpop.f32.mrf.mxu1 }
 0x131   : > { %504 = vst.msk [vmem:[#allocation3 + $0x8] sm:$0xf] %vm501_vm2, %v1700_v12  ;;  %v1698_v14 = vpack.c.bf16 %v438_v13, %v438_v13 }
 0x132   : > { %v1770_v15 = vpop.f32.mrf.mxu1 }
 0x133   : > { %502 = vst.msk [vmem:[#allocation3] sm:$0xf] %vm501_vm2, %v1698_v14  ;;  %v1701_v16 = vpack.c.bf16 %v1770_v15, %v1770_v15 }
 0x134   : > { %v441_v17 = vpop.f32.mrf.mxu1 }
 0x135   : > { %v356_v18 = vpop.f32.mrf.mxu0  ;;  %505 = vst.msk [vmem:[#allocation3 + $0xc] sm:$0xf] %vm501_vm2, %v1701_v16  ;;  %v1699_v19 = vpack.c.bf16 %v441_v17, %v441_v17 }
 0x136   : > { %v362_v20 = vpack.c.bf16 %v356_v18, %v356_v18  ;;  %v1773_v21 = vpop.f32.mrf.mxu1 }
 0x137   : > { %v1763_v22 = vpop.f32.mrf.mxu0  ;;  %503 = vst.msk [vmem:[#allocation3 + $0x4] sm:$0xf] %vm501_vm2, %v1699_v19  ;;  %v1704_v23 = vpack.c.bf16 %v1773_v21, %v1773_v21 }
 0x138   : > { %363 = vst [vmem:[#allocation2] sm:$0xf] %v362_v20  ;;  %v454_v24 = vpop.f32.mrf.mxu1  ;;  %v734_v38 = vld [vmem:[#allocation3 + $0x8] sm:$0xf] }
 0x139   : > { %v359_v25 = vpop.f32.mrf.mxu0  ;;  %508 = vst.msk [vmem:[#allocation3 + $0x18] sm:$0xf] %vm501_vm2, %v1704_v23  ;;  %v1702_v26 = vpack.c.bf16 %v454_v24, %v454_v24  ;;  %v741_v40 = vsel %vm516_vm3, %v734_v38, 0 }
 0x13a   : > { %v511_v27 = vld [vmem:[#allocation3] sm:$0xf]  ;;  %v1774_v28 = vpop.f32.mrf.mxu1 }
 0x13b   : > { %v1764_v29 = vpop.f32.mrf.mxu0  ;;  %v518_v30 = vsel %vm516_vm3, %v511_v27, 0  ;;  %506 = vst.msk [vmem:[#allocation3 + $0x10] sm:$0xf] %vm501_vm2, %v1702_v26  ;;  %v1705_v31 = vpack.c.bf16 %v1774_v28, %v1774_v28 }
 0x13c   : > { %1776 = vmatpush3.bf16.msra.mxu1 %v518_v30  ;;  %v457_v32 = vpop.f32.mrf.mxu1  ;;  %v844_v41 = vld [vmem:[#allocation3 + $0xc] sm:$0xf] }
 0x13d   : > { %509 = vst.msk [vmem:[#allocation3 + $0x1c] sm:$0xf] %vm501_vm2, %v1705_v31  ;;  %v1703_v33 = vpack.c.bf16 %v457_v32, %v457_v32  ;;  %1781 = vmatprep.subr.bf16.mxu1 %v2211_v0  ;;  %v851_v43 = vsel %vm516_vm3, %v844_v41, 0 }
 0x13e   : > { %v624_v34 = vld [vmem:[#allocation3 + $0x4] sm:$0xf] }
 0x13f   : > { %v510_v35 = vld [vmem:[#allocation2] sm:$0xf]  ;;  %v631_v36 = vsel %vm516_vm3, %v624_v34, 0  ;;  %507 = vst.msk [vmem:[#allocation3 + $0x14] sm:$0xf] %vm501_vm2, %v1703_v33 }
 0x140   : > { %1778 = vmatmul.mubr.msk.bf16.vlgmr.msra.gmra.mxu1 %vm512_vm4, %v510_v35  ;;  %v2432_v37 = vcombine.low %v510_v35, %v510_v35  ;;  %1788 = vmatpush3.bf16.msra.mxu0 %v631_v36  ;;  %v1174_v50 = vld [vmem:[#allocation3 + $0x18] sm:$0xf] }
 0x141   : > { %1799 = vmatprep.subr.bf16.mxu0 %v2211_v0  ;;  %1783 = vmatprep.mubr.msk.bf16.mxu1 %vm2212_vm0, %v2211_v0  ;;  %v1181_v52 = vsel %vm516_vm3, %v1174_v50, 0 }
 0x142   : > { %845 = vrot.lane.b32.xlu1 %v2432_v37, %s2213_s24  ;;  %625 = vrot.lane.b32.xlu0 %v2432_v37, %s2214_s26  ;;  %v954_v44 = vld [vmem:[#allocation3 + $0x10] sm:$0xf]  ;;  %s1649_s24 = sshll.u32 %s2385_s23, 3 }
 0x143   : > { %v961_v45 = vsel %vm516_vm3, %v954_v44, 0 }
 0x144   : > { %v1284_v53 = vld [vmem:[#allocation3 + $0x1c] sm:$0xf] }
 0x145   : > { %v1291_v55 = vsel %vm516_vm3, %v1284_v53, 0 }
 0x146   : > { %955 = vrot.lane.b32.xlu1 %v2432_v37, %s2215_s13  ;;  %735 = vrot.lane.b32.xlu0 %v2432_v37, %s2216_s15  ;;  %v1064_v47 = vld [vmem:[#allocation3 + $0x14] sm:$0xf]  ;;  %s1695_s15 = sshll.u32 %s2280_s22, 7 }
 0x147   : > { %v1071_v49 = vsel %vm516_vm3, %v1064_v47, 0 }
 0x14a   : > { %1175 = vrot.lane.b32.xlu1 %v2432_v37, %s2217_s16  ;;  %1065 = vrot.lane.b32.xlu0 %v2432_v37, %s2218_s17  ;;  %s283_s16 = scalar_lea.vmem [#allocation13], %s1649_s24 }
 0x14b   : > { %s1537_s17 = sshll.u32 %s283_s16, 4  ;;  %s2611_s17 = int_to_ptr.vmem [resolvable:$true] %s1537_s17 }
 0x14c   : > { %s2131_s22 = scalar_lea.vmem %s2611_s17, 128 }
 0x14d   : > { %p2132_p4 = scmp.ne.s32.totalorder %s2611_s17, %s2131_s22 }
 0x14e   : > { %1285 = vrot.lane.b32.xlu0 %v2432_v37, %s2219_s12 }
 0x14f   : > { %p2133_p12 = pnand %p2132_p4, %p2676_p6 }
 0x151   : > { %p2134_p0 = pneg %p2133_p12 }
 0x1b4   : > { %v626_v39 = vpop.permute.xlu0 %625  ;;  %v846_v46 = vpop.permute.xlu1 %845 }
 0x1b5   : > { %1790 = vmatmul.mubr.msk.bf16.vlgmr.msra.gmra.mxu0 %vm512_vm4, %v626_v39 }
 0x1b6   : > { %1800 = vmatpush3.bf16.msra.mxu0 %v741_v40  ;;  %1801 = vmatprep.mubr.msk.bf16.mxu0 %vm2212_vm0, %v2211_v0 }
 0x1b7   : > { %1811 = vmatprep.subr.bf16.mxu0 %v2211_v0 }
 0x1b8   : > { %v736_v42 = vpop.permute.xlu0 %735  ;;  %v956_v48 = vpop.permute.xlu1 %955 }
 0x1bc   : > { %v1066_v51 = vpop.permute.xlu0 %1065  ;;  %v1176_v54 = vpop.permute.xlu1 %1175 }
 0x1bd   : > { %1802 = vmatmul.mubr.msk.bf16.vlgmr.msra.gmra.mxu0 %vm512_vm4, %v736_v42 }
 0x1be   : > { %1812 = vmatpush3.bf16.msra.mxu0 %v851_v43  ;;  %1813 = vmatprep.mubr.msk.bf16.mxu0 %vm2212_vm0, %v2211_v0 }
 0x1bf   : > { %1823 = vmatprep.subr.bf16.mxu0 %v2211_v0 }
 0x1c0   : > { %v1286_v56 = vpop.permute.xlu0 %1285 }
 0x1c5   : > { %1814 = vmatmul.mubr.msk.bf16.vlgmr.msra.gmra.mxu0 %vm512_vm4, %v846_v46 }
 0x1c6   : > { %1824 = vmatpush3.bf16.msra.mxu0 %v961_v45  ;;  %1825 = vmatprep.mubr.msk.bf16.mxu0 %vm2212_vm0, %v2211_v0 }
 0x1c7   : > { %1835 = vmatprep.subr.bf16.mxu0 %v2211_v0 }
 0x1cd   : > { %1826 = vmatmul.mubr.msk.bf16.vlgmr.msra.gmra.mxu0 %vm512_vm4, %v956_v48 }
 0x1ce   : > { %1836 = vmatpush3.bf16.msra.mxu0 %v1071_v49  ;;  %1837 = vmatprep.mubr.msk.bf16.mxu0 %vm2212_vm0, %v2211_v0 }
 0x1cf   : > { %1847 = vmatprep.subr.bf16.mxu0 %v2211_v0 }
 0x1d5   : > { %1838 = vmatmul.mubr.msk.bf16.vlgmr.msra.gmra.mxu0 %vm512_vm4, %v1066_v51 }
 0x1d6   : > { %1848 = vmatpush3.bf16.msra.mxu0 %v1181_v52  ;;  %1849 = vmatprep.mubr.msk.bf16.mxu0 %vm2212_vm0, %v2211_v0 }
 0x1d7   : > { %1859 = vmatprep.subr.bf16.mxu0 %v2211_v0 }
 0x1dd   : > { %1850 = vmatmul.mubr.msk.bf16.vlgmr.msra.gmra.mxu0 %vm512_vm4, %v1176_v54 }
 0x1de   : > { %1860 = vmatpush3.bf16.msra.mxu0 %v1291_v55  ;;  %1861 = vmatprep.mubr.msk.bf16.mxu0 %vm2212_vm0, %v2211_v0 }
 0x1df   : > { %1871 = vmatprep.subr.bf16.mxu0 %v2211_v0 }
 0x1e5   : > { %1862 = vmatmul.mubr.msk.bf16.vlgmr.msra.gmra.mxu0 %vm512_vm4, %v1286_v56 }
 0x1e6   : > { %1879 = vmatprep.mubr.msk.bf16.mxu0 %vm2212_vm0, %v2211_v0 }
 0x200   : > { %v554_v57 = vpop.f32.mrf.mxu1 }
 0x201   : > { %v560_v58 = vsel %vm512_vm4, %v554_v57, -inf }
 0x202   : > { %561 = vmax.xlane.f32.xlu1 %v560_v58  ;;  %v1779_v59 = vpop.f32.mrf.mxu1 }
 0x204   : > { %v557_v60 = vpop.f32.mrf.mxu1 }
 0x206   : > { %v1780_v61 = vpop.f32.mrf.mxu1 }
 0x275   : > { %v667_v62 = vpop.f32.mrf.mxu0 }
 0x276   : > { %v673_v63 = vsel %vm512_vm4, %v667_v62, -inf }
 0x277   : > { %674 = vmax.xlane.f32.xlu0 %v673_v63  ;;  %v1791_v1 = vpop.f32.mrf.mxu0 }
 0x279   : > { %v670_v2 = vpop.f32.mrf.mxu0 }
 0x27b   : > { %v1792_v3 = vpop.f32.mrf.mxu0 }
 0x27d   : > { %v777_v4 = vpop.f32.mrf.mxu0 }
 0x27e   : > { %v783_v5 = vsel %vm512_vm4, %v777_v4, -inf }
 0x27f   : > { %784 = vmax.xlane.f32.xlu0 %v783_v5  ;;  %v1803_v6 = vpop.f32.mrf.mxu0 }
 0x281   : > { %v780_v7 = vpop.f32.mrf.mxu0 }
 0x283   : > { %v1804_v8 = vpop.f32.mrf.mxu0 }
 0x285   : > { %v887_v9 = vpop.f32.mrf.mxu0 }
 0x286   : > { %v893_v10 = vsel %vm512_vm4, %v887_v9, -inf }
 0x287   : > { %v1815_v11 = vpop.f32.mrf.mxu0  ;;  %894 = vmax.xlane.f32.xlu1 %v893_v10 }
 0x289   : > { %v890_v12 = vpop.f32.mrf.mxu0 }
 0x28b   : > { %v1816_v13 = vpop.f32.mrf.mxu0  ;;  %v562_v33 = vpop.xlane.xlu1 %561 }
 0x28c   : > { %v563_v34 = vsub.f32 %v554_v57, %v562_v33 }
 0x28d   : > { %v997_v14 = vpop.f32.mrf.mxu0 }
 0x28e   : > { %v1003_v15 = vsel %vm512_vm4, %v997_v14, -inf  ;;  %v564_v35 = vmul.f32 1.442695, %v563_v34 }
 0x28f   : > { %1004 = vmax.xlane.f32.xlu0 %v1003_v15  ;;  %v1827_v16 = vpop.f32.mrf.mxu0 }
 0x290   : > { %1993 = vpow2.f32 %v564_v35 }
 0x291   : > { %v1000_v17 = vpop.f32.mrf.mxu0 }
 0x293   : > { %v1828_v18 = vpop.f32.mrf.mxu0 }
 0x295   : > { %v2482_v19 = vpop.f32.mrf.mxu0 }
 0x296   : > { %v1113_v20 = vsel %vm512_vm4, %v2482_v19, -inf }
 0x297   : > { %1114 = vmax.xlane.f32.xlu1 %v1113_v20  ;;  %v1839_v21 = vpop.f32.mrf.mxu0 }
 0x299   : > { %v1110_v22 = vpop.f32.mrf.mxu0 }
 0x29b   : > { %v1840_v23 = vpop.f32.mrf.mxu0 }
 0x29d   : > { %v1217_v24 = vpop.f32.mrf.mxu0  ;;  %v2494_v38 = vpop.eup %1993 }
 0x29e   : > { %v1223_v25 = vsel %vm512_vm4, %v1217_v24, -inf  ;;  %v566_v39 = vsel %vm512_vm4, %v2494_v38, 0.0 }
 0x29f   : > { %1224 = vmax.xlane.f32.xlu0 %v1223_v25  ;;  %v1851_v26 = vpop.f32.mrf.mxu0 }
 0x2a1   : > { %v1220_v27 = vpop.f32.mrf.mxu0 }
 0x2a3   : > { %v1852_v28 = vpop.f32.mrf.mxu0 }
 0x2a5   : > { %v2487_v29 = vpop.f32.mrf.mxu0 }
 0x2a6   : > { %v1333_v36 = vsel %vm512_vm4, %v2487_v29, -inf }
 0x2a7   : > { %v1863_v30 = vpop.f32.mrf.mxu0 }
 0x2a8   : > { %685 = vrot.lane.b32.xlu1 %v2432_v37, %s2220_s8 }
 0x2a9   : > { %v1330_v31 = vpop.f32.mrf.mxu0 }
 0x2ab   : > { %v1864_v32 = vpop.f32.mrf.mxu0 }
 0x2b5   : > { %575 = vrot.lane.b32.xlu0 %v2432_v37, %s2221_s10  ;;  %s2609_s10 = scalar_lea.hbm %s2658_s5, %s1695_s15 }
 0x2cc   : > { %1334 = vmax.xlane.f32.xlu1 %v1333_v36 }
 0x2d4   : > { %567 = vadd.xlane.f32.xlu0 %v566_v39 }
 0x2dd   : > { %795 = vrot.lane.b32.xlu1 %v2432_v37, %s2222_s9 }
 0x300   : > { %v675_v40 = vpop.xlane.xlu0 %674 }
 0x301   : > { %v676_v41 = vsub.f32 %v667_v62, %v675_v40 }
 0x303   : > { %v677_v42 = vmul.f32 1.442695, %v676_v41 }
 0x305   : > { %1995 = vpow2.f32 %v677_v42 }
 0x308   : > { %v785_v43 = vpop.xlane.xlu0 %784 }
 0x309   : > { %v786_v44 = vsub.f32 %v777_v4, %v785_v43 }
 0x30b   : > { %v787_v45 = vmul.f32 1.442695, %v786_v44 }
 0x30d   : > { %1997 = vpow2.f32 %v787_v45 }
 0x310   : > { %v895_v46 = vpop.xlane.xlu1 %894 }
 0x311   : > { %v896_v47 = vsub.f32 %v887_v9, %v895_v46 }
 0x312   : > { %v2500_v48 = vpop.eup %1995 }
 0x313   : > { %v897_v49 = vmul.f32 1.442695, %v896_v47  ;;  %v679_v50 = vsel %vm512_vm4, %v2500_v48, 0.0 }
 0x314   : > { %680 = vadd.xlane.f32.xlu1 %v679_v50 }
 0x315   : > { %1999 = vpow2.f32 %v897_v49 }
 0x318   : > { %v1005_v51 = vpop.xlane.xlu0 %1004 }
 0x319   : > { %v1006_v52 = vsub.f32 %v997_v14, %v1005_v51 }
 0x31a   : > { %v2504_v53 = vpop.eup %1997 }
 0x31b   : > { %v1007_v54 = vmul.f32 1.442695, %v1006_v52  ;;  %v789_v55 = vsel %vm512_vm4, %v2504_v53, 0.0 }
 0x31c   : > { %790 = vadd.xlane.f32.xlu0 %v789_v55 }
 0x31d   : > { %2001 = vpow2.f32 %v1007_v54 }
 0x320   : > { %v1115_v2 = vpop.xlane.xlu1 %1114 }
 0x321   : > { %v1116_v3 = vsub.f32 %v2482_v19, %v1115_v2 }
 0x322   : > { %v2508_v56 = vpop.eup %1999 }
 0x323   : > { %v899_v57 = vsel %vm512_vm4, %v2508_v56, 0.0  ;;  %v1117_v6 = vmul.f32 1.442695, %v1116_v3 }
 0x324   : > { %900 = vadd.xlane.f32.xlu1 %v899_v57  ;;  %v686_v9 = vpop.permute.xlu1 %685 }
 0x325   : > { %v691_v19 = vsel %vm516_vm3, %v686_v9, 0 }
 0x328   : > { %v1225_v58 = vpop.xlane.xlu0 %1224 }
 0x329   : > { %v1226_v59 = vsub.f32 %v1217_v24, %v1225_v58 }
 0x32a   : > { %v2512_v60 = vpop.eup %2001 }
 0x32b   : > { %v1227_v61 = vmul.f32 1.442695, %v1226_v59  ;;  %v1009_v62 = vsel %vm512_vm4, %v2512_v60, 0.0 }
 0x32c   : > { %v576_v63 = vpop.permute.xlu0 %575  ;;  %1010 = vadd.xlane.f32.xlu1 %v1009_v62 }
 0x32d   : > { %2003 = vpow2.f32 %v1227_v61  ;;  %v581_v1 = vsel %vm516_vm3, %v576_v63, 0 }
 0x32e   : > { %1782 = vmatpush3.bf16.msra.mxu1 %v581_v1  ;;  %2005 = vpow2.f32 %v1117_v6 }
 0x32f   : > { %1793 = vmatprep.subr.bf16.mxu1 %v2211_v0 }
 0x332   : > { %905 = vrot.lane.b32.xlu0 %v2432_v37, %s2223_s11 }
 0x33a   : > { %v2521_v4 = vpop.eup %2003 }
 0x33b   : > { %v1229_v5 = vsel %vm512_vm4, %v2521_v4, 0.0  ;;  %v2525_v7 = vpop.eup %2005 }
 0x33c   : > { %1230 = vadd.xlane.f32.xlu1 %v1229_v5  ;;  %v1119_v8 = vsel %vm512_vm4, %v2525_v7, 0.0 }
 0x351   : > { %1120 = vadd.xlane.f32.xlu0 %v1119_v8 }
 0x355   : > { %v1335_v10 = vpop.xlane.xlu1 %1334 }
 0x356   : > { %v1336_v11 = vsub.f32 %v2487_v29, %v1335_v10 }
 0x358   : > { %v1337_v12 = vmul.f32 1.442695, %v1336_v11 }
 0x359   : > { %v796_v20 = vpop.permute.xlu1 %795 }
 0x35a   : > { %2007 = vpow2.f32 %v1337_v12  ;;  %v801_v27 = vsel %vm516_vm3, %v796_v20, 0 }
 0x35d   : > { %v568_v13 = vpop.xlane.xlu0 %567 }
 0x35e   : > { %2009 = vrcp.f32 %v568_v13 }
 0x367   : > { %v2530_v14 = vpop.eup %2007  ;;  %1125 = vrot.lane.b32.xlu0 %v2432_v37, %s2224_s14 }
 0x368   : > { %v1339_v15 = vsel %vm512_vm4, %v2530_v14, 0.0 }
 0x369   : > { %1340 = vadd.xlane.f32.xlu1 %v1339_v15 }
 0x36b   : > { %v2010_v16 = vpop.eup %2009  ;;  %1235 = vrot.lane.b32.xlu0 %v2432_v37, %s2225_s27 }
 0x36c   : > { %v570_v17 = vmul.f32 %v2010_v16, %v2494_v38 }
 0x36e   : > { %v571_v18 = vpack.c.bf16 %v570_v17, %v570_v17 }
 0x36f   : > { %1345 = vrot.lane.b32.xlu0 %v2432_v37, %s2226_s30 }
 0x370   : > { %1784 = vmatmul.mubr.msk.bf16.vlgmr.msra.gmra.mxu1 %vm512_vm4, %v571_v18 }
 0x371   : > { %1794 = vmatpush3.bf16.msra.mxu1 %v691_v19  ;;  %1795 = vmatprep.mubr.msk.bf16.mxu1 %vm2212_vm0, %v2211_v0 }
 0x372   : > { %1805 = vmatprep.subr.bf16.mxu1 %v2211_v0 }
 0x37a   : > { %1015 = vrot.lane.b32.xlu1 %v2432_v37, %s2227_s29 }
 0x39d   : > { %v681_v21 = vpop.xlane.xlu1 %680 }
 0x39e   : > { %2011 = vrcp.f32 %v681_v21  ;;  %v1989_v21 = vld [vmem:[#allocation11 + $0x18] sm:$0xff]  }
 0x39f   : > { %1872 = vmatpush3.bf16.msra.mxu0 %v1989_v21 }
 0x3a0   : > { %1873 = vmatprep.subr.bf16.mxu0 %v2211_v0 }
 0x3a5   : > { %v791_v22 = vpop.xlane.xlu0 %790 }
 0x3a6   : > { %2013 = vrcp.f32 %v791_v22 }
 0x3a9   : > { %v906_v29 = vpop.permute.xlu0 %905 }
 0x3aa   : > { %v911_v31 = vsel %vm516_vm3, %v906_v29, 0 }
 0x3ab   : > { %v2012_v23 = vpop.eup %2011 }
 0x3ac   : > { %v683_v24 = vmul.f32 %v2012_v23, %v2500_v48  ;;  %v1990_v23 = vld [vmem:[#allocation11 + $0x10] sm:$0xff]  }
 0x3ad   : > { %v901_v25 = vpop.xlane.xlu1 %900  ;;  %1874 = vmatpush3.bf16.msra.mxu0 %v1990_v23 }
 0x3ae   : > { %2015 = vrcp.f32 %v901_v25  ;;  %v684_v26 = vpack.c.bf16 %v683_v24, %v683_v24  ;;  %1875 = vmatprep.subr.bf16.mxu0 %v2211_v0 }
 0x3b0   : > { %1796 = vmatmul.mubr.msk.bf16.vlgmr.msra.gmra.mxu1 %vm512_vm4, %v684_v26 }
 0x3b1   : > { %1806 = vmatpush3.bf16.msra.mxu1 %v801_v27  ;;  %1807 = vmatprep.mubr.msk.bf16.mxu1 %vm2212_vm0, %v2211_v0 }
 0x3b2   : > { %1817 = vmatprep.subr.bf16.mxu1 %v2211_v0 }
 0x3b3   : > { %v2014_v37 = vpop.eup %2013 }
 0x3b4   : > { %v793_v28 = vmul.f32 %v2014_v37, %v2504_v53  ;;  %v1991_v37 = vld [vmem:[#allocation11 + $0x8] sm:$0xff]  }
 0x3b5   : > { %v1011_v35 = vpop.xlane.xlu1 %1010  ;;  %1876 = vmatpush3.bf16.msra.mxu0 %v1991_v37 }
 0x3b6   : > { %v794_v30 = vpack.c.bf16 %v793_v28, %v793_v28  ;;  %2017 = vrcp.f32 %v1011_v35  ;;  %1877 = vmatprep.subr.bf16.mxu0 %v2211_v0 }
 0x3b8   : > { %1808 = vmatmul.mubr.msk.bf16.vlgmr.msra.gmra.mxu1 %vm512_vm4, %v794_v30  ;;  %v1992_v30 = vld [vmem:[#allocation11] sm:$0xff]  }
 0x3b9   : > { %1818 = vmatpush3.bf16.msra.mxu1 %v911_v31  ;;  %1819 = vmatprep.mubr.msk.bf16.mxu1 %vm2212_vm0, %v2211_v0 }
 0x3ba   : > { %1829 = vmatprep.subr.bf16.mxu1 %v2211_v0  ;;  %1878 = vmatpush3.bf16.msra.mxu0 %v1992_v30 }
 0x3bb   : > { %v2016_v32 = vpop.eup %2015 }
 0x3bc   : > { %v903_v33 = vmul.f32 %v2016_v32, %v2508_v56 }
 0x3be   : > { %v904_v34 = vpack.c.bf16 %v903_v33, %v903_v33 }
 0x3c0   : > { %1820 = vmatmul.mubr.msk.bf16.vlgmr.msra.gmra.mxu1 %vm512_vm4, %v904_v34 }
 0x3c1   : > { %1831 = vmatprep.mubr.msk.bf16.mxu1 %vm2212_vm0, %v2211_v0 }
 0x3c3   : > { %v2018_v39 = vpop.eup %2017 }
 0x3c4   : > { %v1013_v41 = vmul.f32 %v2018_v39, %v2512_v60 }
 0x3c5   : > { %v1231_v38 = vpop.xlane.xlu1 %1230 }
 0x3c6   : > { %v1014_v45 = vpack.c.bf16 %v1013_v41, %v1013_v41 }
 0x3da   : > { %v1121_v36 = vpop.xlane.xlu0 %1120 }
 0x3db   : > { %2019 = vrcp.f32 %v1121_v36 }
 0x3dc   : > { %2021 = vrcp.f32 %v1231_v38 }
 0x3de   : > { %v1126_v44 = vpop.permute.xlu0 %1125 }
 0x3df   : > { %v1131_v47 = vsel %vm516_vm3, %v1126_v44, 0 }
 0x3e2   : > { %v1236_v49 = vpop.permute.xlu0 %1235 }
 0x3e3   : > { %v1241_v52 = vsel %vm516_vm3, %v1236_v49, 0 }
 0x3e6   : > { %v1346_v54 = vpop.permute.xlu0 %1345 }
 0x3e7   : > { %v1351_v57 = vsel %vm516_vm3, %v1346_v54, 0 }
 0x3e8   : > { %v2020_v46 = vpop.eup %2019 }
 0x3e9   : > { %v1123_v48 = vmul.f32 %v2020_v46, %v2525_v7  ;;  %v2022_v51 = vpop.eup %2021 }
 0x3ea   : > { %v1233_v53 = vmul.f32 %v2022_v51, %v2521_v4 }
 0x3eb   : > { %v1124_v50 = vpack.c.bf16 %v1123_v48, %v1123_v48 }
 0x3ec   : > { %v1234_v55 = vpack.c.bf16 %v1233_v53, %v1233_v53 }
 0x3f2   : > { %v1341_v40 = vpop.xlane.xlu1 %1340 }
 0x3f3   : > { %2023 = vrcp.f32 %v1341_v40 }
 0x3f6   : > { %v1016_v42 = vpop.permute.xlu1 %1015 }
 0x3f7   : > { %v1021_v43 = vsel %vm516_vm3, %v1016_v42, 0 }
 0x3f8   : > { %1830 = vmatpush3.bf16.msra.mxu1 %v1021_v43 }
 0x3f9   : > { %1841 = vmatprep.subr.bf16.mxu1 %v2211_v0 }
 0x3fb   : > { %1832 = vmatmul.mubr.msk.bf16.vlgmr.msra.gmra.mxu1 %vm512_vm4, %v1014_v45 }
 0x3fc   : > { %1842 = vmatpush3.bf16.msra.mxu1 %v1131_v47  ;;  %1843 = vmatprep.mubr.msk.bf16.mxu1 %vm2212_vm0, %v2211_v0 }
 0x3fd   : > { %1853 = vmatprep.subr.bf16.mxu1 %v2211_v0 }
 0x400   : > { %v2024_v56 = vpop.eup %2023 }
 0x401   : > { %v1343_v58 = vmul.f32 %v2024_v56, %v2530_v14 }
 0x403   : > { %1844 = vmatmul.mubr.msk.bf16.vlgmr.msra.gmra.mxu1 %vm512_vm4, %v1124_v50  ;;  %v1344_v59 = vpack.c.bf16 %v1343_v58, %v1343_v58 }
 0x404   : > { %1854 = vmatpush3.bf16.msra.mxu1 %v1241_v52  ;;  %1855 = vmatprep.mubr.msk.bf16.mxu1 %vm2212_vm0, %v2211_v0 }
 0x405   : > { %1865 = vmatprep.subr.bf16.mxu1 %v2211_v0 }
 0x40b   : > { %1856 = vmatmul.mubr.msk.bf16.vlgmr.msra.gmra.mxu1 %vm512_vm4, %v1234_v55  ;;  %v1688_v55 = vld [vmem:[%s2657_s4] ss:$0 sm:$0xff] }
 0x40c   : > { %1866 = vmatpush3.bf16.msra.mxu1 %v1351_v57  ;;  %1867 = vmatprep.mubr.msk.bf16.mxu1 %vm2212_vm0, %v2211_v0 }
 0x413   : > { %1868 = vmatmul.mubr.msk.bf16.vlgmr.msra.gmra.mxu1 %vm512_vm4, %v1344_v59 }
 0x430   : > { %v2585_v60 = vpop.f32.mrf.mxu1 }
 0x431   : > { %v623_v43 = vpack.c.bf16 %v2585_v60, %v2585_v60 }
 0x432   : > { %v1785_v61 = vpop.f32.mrf.mxu1 }
 0x434   : > { %v620_v62 = vpop.f32.mrf.mxu1 }
 0x436   : > { %v1786_v63 = vpop.f32.mrf.mxu1 }
 0x470   : > { %v727_v1 = vpop.f32.mrf.mxu1 }
 0x471   : > { %v733_v2 = vpack.c.bf16 %v727_v1, %v727_v1 }
 0x472   : > { %v1797_v3 = vpop.f32.mrf.mxu1 }
 0x473   : > { %1395 = vrot.lane.b32.xlu1 %v733_v2, %s2226_s30 }
 0x474   : > { %v730_v4 = vpop.f32.mrf.mxu1 }
 0x476   : > { %v1798_v5 = vpop.f32.mrf.mxu1 }
 0x478   : > { %v837_v6 = vpop.f32.mrf.mxu1 }
 0x479   : > { %v843_v7 = vpack.c.bf16 %v837_v6, %v837_v6 }
 0x47a   : > { %v1809_v8 = vpop.f32.mrf.mxu1 }
 0x47b   : > { %1398 = vrot.lane.b32.xlu0 %v843_v7, %s2225_s27 }
 0x47c   : > { %v840_v9 = vpop.f32.mrf.mxu1 }
 0x47e   : > { %v1810_v10 = vpop.f32.mrf.mxu1 }
 0x480   : > { %v947_v11 = vpop.f32.mrf.mxu1 }
 0x481   : > { %v953_v12 = vpack.c.bf16 %v947_v11, %v947_v11 }
 0x482   : > { %v1821_v13 = vpop.f32.mrf.mxu1 }
 0x483   : > { %1401 = vrot.lane.b32.xlu1 %v953_v12, %s2224_s14 }
 0x484   : > { %v950_v14 = vpop.f32.mrf.mxu1 }
 0x486   : > { %v1822_v15 = vpop.f32.mrf.mxu1 }
 0x4bb   : > { %v1057_v16 = vpop.f32.mrf.mxu1 }
 0x4bc   : > { %v1063_v17 = vpack.c.bf16 %v1057_v16, %v1057_v16 }
 0x4bd   : > { %v1833_v18 = vpop.f32.mrf.mxu1 }
 0x4be   : > { %1404 = vrot.lane.b32.xlu0 %v1063_v17, %s2227_s29 }
 0x4bf   : > { %v1060_v19 = vpop.f32.mrf.mxu1 }
 0x4c1   : > { %v1834_v20 = vpop.f32.mrf.mxu1 }
 0x4c3   : > { %v1167_v22 = vpop.f32.mrf.mxu1 }
 0x4c4   : > { %v1173_v24 = vpack.c.bf16 %v1167_v22, %v1167_v22 }
 0x4c5   : > { %v1845_v25 = vpop.f32.mrf.mxu1 }
 0x4c6   : > { %1407 = vrot.lane.b32.xlu1 %v1173_v24, %s2223_s11  ;;  %s2228_s11 = smov [#allocation13]  }
 0x4c7   : > { %v1170_v26 = vpop.f32.mrf.mxu1  ;;  %s2135_s14 = sshll.u32 %s2228_s11, 4  ;;  %s2136_s14 = int_to_ptr.vmem [resolvable:$false] %s2135_s14 }
 0x4c8   : > { %s2137_s27 = scalar_lea.vmem %s2136_s14, 256  ;;  %p2138_p5 = scmp.lt.s32.totalorder %s2611_s17, %s2136_s14 }
 0x4c9   : > { %v1846_v27 = vpop.f32.mrf.mxu1  ;;  %p2139_p3 = scmp.lt.s32.totalorder %s2137_s27, %s2131_s22 }
 0x4cb   : > { %v1277_v28 = vpop.f32.mrf.mxu1  ;;  %p2140_p7 = por %p2139_p3, %p2138_p5 }
 0x4cc   : > { %v1283_v29 = vpack.c.bf16 %v1277_v28, %v1277_v28 }
 0x4cd   : > { %v1857_v31 = vpop.f32.mrf.mxu1  ;;  %p2141_p9 = pnand %p2140_p7, %p2134_p0 }
 0x4ce   : > { %1410 = vrot.lane.b32.xlu0 %v1283_v29, %s2222_s9  ;;  %s1524_s9 = scalar_lea.sflag [#allocation7], %s2385_s23 }
 0x4cf   : > { %v1280_v32 = vpop.f32.mrf.mxu1 }
 0x4d1   : > { %v1858_v33 = vpop.f32.mrf.mxu1 }
 0x4d3   : > { %v1387_v34 = vpop.f32.mrf.mxu1 }
 0x4d4   : > { %v1393_v35 = vpack.c.bf16 %v1387_v34, %v1387_v34 }
 0x4d5   : > { %v1869_v36 = vpop.f32.mrf.mxu1 }
 0x4d6   : > { %1413 = vrot.lane.b32.xlu1 %v1393_v35, %s2220_s8 }
 0x4d7   : > { %v1390_v38 = vpop.f32.mrf.mxu1 }
 0x4d9   : > { %v1870_v39 = vpop.f32.mrf.mxu1 }
 0x4e5   : > { %v1396_v40 = vpop.permute.xlu1 %1395 }
 0x4e6   : > { %v1417_v44 = vsel %vm512_vm4, %v623_v43, %v1396_v40 }
 0x4ed   : > { %v1399_v41 = vpop.permute.xlu0 %1398 }
 0x4ee   : > { %v1420_v45 = vsel %vm1418_vm5, %v1417_v44, %v1399_v41 }
 0x4f5   : > { %v1402_v42 = vpop.permute.xlu1 %1401 }
 0x4f6   : > { %v1423_v47 = vsel %vm1421_vm6, %v1420_v45, %v1402_v42 }
 0x530   : > { %v1405_v0 = vpop.permute.xlu0 %1404 }
 0x531   : > { %v1426_v49 = vsel %vm1424_vm7, %v1423_v47, %v1405_v0 }
 0x538   : > { %v1408_v46 = vpop.permute.xlu1 %1407 }
 0x539   : > { %v1429_v50 = vsel %vm1427_vm8, %v1426_v49, %v1408_v46 }
 0x540   : > { %v1411_v48 = vpop.permute.xlu0 %1410 }
 0x541   : > { %v1432_v51 = vsel %vm1430_vm9, %v1429_v50, %v1411_v48 }
 0x548   : > { %v1414_v52 = vpop.permute.xlu1 %1413 }
 0x549   : > { %v1435_v53 = vsel %vm1433_vm10, %v1432_v51, %v1414_v52 }
 0x54a   : > { %1438 = vst.msk [vmem:[#allocation4] sm:$0xf] %vm1437_vm11, %v1435_v53 }
 0x551   : > { %v1439_v54 = vld [vmem:[#allocation4] sm:$0xf] }
 0x552   : > { %1880 = vmatmul.mubr.msk.bf16.vlgmr.msra.gmra.mxu0 %vm318_vm1, %v1439_v54 }
 0x612   : > { %v1516_v56 = vpop.f32.mrf.mxu0 }
 0x613   : > { %v1517_v57 = vadd.f32 %v1688_v55, %v1516_v56 }
 0x614   : > { %v1881_v58 = vpop.f32.mrf.mxu0 }
 0x615   : > { %1522 = vst.msk [vmem:[%s283_s16] sm:$0xff] %vm318_vm1, %v1517_v57 }
 0x616   : > { %v1519_v59 = vpop.f32.mrf.mxu0 }
 0x617   : > { %2144 = shalt.err (!%p2141_p9)
}
 0x618   : > { %s2145_s30 = scalar_lea.hbm %s2609_s10, 128  ;;  %s2149_s24 = scalar_lea.hbm %s2658_s5, 256 }
 0x619   : > { %p2146_p13 = scmp.ne.s32.totalorder %s2609_s10, %s2145_s30  ;;  %p2150_p10 = scmp.lt.s32.totalorder %s2609_s10, %s2658_s5 }
 0x61a   : > { %p2151_p11 = scmp.lt.s32.totalorder %s2149_s24, %s2145_s30 }
 0x61b   : > { %p2147_p1 = pnand %p2146_p13, %p2676_p6 }
 0x61c   : > { %p2152_p2 = por %p2151_p11, %p2150_p10 }
 0x61d   : > { %p2148_p8 = pneg %p2147_p1 }
 0x61f   : > { %p2153_p4 = pnand %p2152_p2, %p2148_p8 }
 0x621   : > { %2156 = shalt.err (!%p2153_p4)
}
 0x622   : > { %1898 = dma.vmem_to_hbm [thread:$0]  (%p2676_p6), %s2611_s17, 128, %s2609_s10, %s1524_s9   ;;  %v1882_v60 = vpop.f32.mrf.mxu0 }
 0x623 PF: > { %s1549_s15 = sand.u32 1, %s2191_s18   ;;  %p2677_p12 = scmp.ne.s32.totalorder %s2664_s25, 0 }
 0x624   : > { %p2678_p0 = scmp.ge.s32.totalorder %s2203_s21, 2  ;;  %s1550_s16 = scalar_lea.sflag [#allocation7], %s1549_s15 }
 0x626   : > { %p1915_p5 = pnand %p2678_p0, %p2677_p12 }
 0x628   : > { %p1916_p3 = pneg %p1915_p5 }
 0x62a   : > { %2186 = dma.done.wait (%p1916_p3), %s1550_s16, 128  }
 0x62b   : > { %2188 = vsyncadd (%p1916_p3), %s1550_s16, 4294967168  ;;  %p20_p7 = scmp.ge.s32.totalorder %s2339_s28, 4   ;;  %s2679_s18 = smov %s2195_s19 }
 0x62c   : > { %s2680_s19 = smov %s2199_s20  ;;  %s2681_s20 = smov %s2349_s6 }
 0x62d   : > { %s2682_s21 = smov %s2339_s28  ;;  %22 = sbr.rel (!%p20_p7) target bundleno = 7 (0x7), region = 97 }
 0x632   :  { %1555 = vsyncpa [#allocation6], 1 }
 0x633   :  { %1557 = vsyncpa [#allocation6 + $0x1], 1 }
 0x634   :  { %1558 = vsyncpa [#allocation9], 1 }
 0x635   :  { %1559 = vsyncpa [#allocation12], 1 }
 0x636   :  { %1560 = vsyncpa [#allocation7], 1 }
 0x637   :  { %1562 = vsyncpa [#allocation7 + $0x1], 1 }

</bundles_post_ra>
